<compile_context>
chip_gen: v5e
topology: v5e:2x2
jax: 0.10.0
libtpu: 0.0.40
codegen_flags: <defaults>
</compile_context>

<pallas_src>
import functools
import math

import jax
import jax.numpy as jnp
from jax.experimental import pallas as pl
from jax.experimental.pallas import tpu as pltpu

LN_EPS = 1e-12                 # HF BERT layer_norm_eps
_INV_SQRT2 = 0.7071067811865476


# ---------------------------------------------------------------------------
# math helpers (usable both inside Pallas kernels and in the plain-JAX reference)
# ---------------------------------------------------------------------------
def _layernorm(x, gamma, beta):
    mu = jnp.mean(x, axis=-1, keepdims=True)
    var = jnp.mean((x - mu) ** 2, axis=-1, keepdims=True)
    return (x - mu) * jax.lax.rsqrt(var + LN_EPS) * gamma + beta


def _gelu_erf(x):
    # exact erf-GELU (HF "gelu"); erf runs on the EUP/special-function path.
    return 0.5 * x * (1.0 + jax.lax.erf(x * _INV_SQRT2))


def _gelu_poly(x):
    # fallback erf: Abramowitz & Stegun 7.1.26 (|err| < 1.5e-7)
    a1, a2, a3, a4, a5 = 0.254829592, -0.284496736, 1.421413741, -1.453152027, 1.061405429
    p = 0.3275911
    z = x * _INV_SQRT2
    sgn = jnp.where(z >= 0.0, 1.0, -1.0)
    az = jnp.abs(z)
    t = 1.0 / (1.0 + p * az)
    poly = ((((a5 * t + a4) * t + a3) * t + a2) * t + a1) * t
    erf = sgn * (1.0 - poly * jnp.exp(-az * az))
    return 0.5 * x * (1.0 + erf)


def _erf_probe_kernel(x_ref, o_ref):
    o_ref[...] = jax.lax.erf(x_ref[...])


_GELU_FN = None


def _get_gelu():
    """Use lax.erf GELU if it lowers on this Pallas/Mosaic build, else the polynomial."""
    global _GELU_FN
    if _GELU_FN is None:
        try:
            out = pl.pallas_call(
                _erf_probe_kernel,
                out_shape=jax.ShapeDtypeStruct((8, 128), jnp.float32),
            )(jnp.zeros((8, 128), jnp.float32))
            jax.block_until_ready(out)
            _GELU_FN = _gelu_erf
        except Exception:           # pragma: no cover - depends on Mosaic build
            _GELU_FN = _gelu_poly
    return _GELU_FN


# ---------------------------------------------------------------------------
# embedding kernel: fused gather + add + LayerNorm
# ---------------------------------------------------------------------------
def _emb_kernel(ids_ref,                    # SMEM (B, S) int32  (scalar prefetch)
                wemb_hbm,                   # HBM  (vocab, H)    (memory_space=ANY)
                pos_ref, typ_ref, gamma_ref, beta_ref,   # VMEM blocks
                o_ref,                      # (1, S, H) output block for batch row bi
                gbuf, sems):                # scratch: VMEM (S, H) f32, DMA sems (S,)
    bi = pl.program_id(0)
    S = gbuf.shape[0]

    # fused word-embedding gather: one small row DMA per token, all in flight at once.
    def row_copy(s):
        return pltpu.make_async_copy(
            wemb_hbm.at[pl.ds(ids_ref[bi, s], 1)],
            gbuf.at[pl.ds(s, 1)],
            sems.at[s])

    for s in range(S):
        row_copy(s).start()
    for s in range(S):
        row_copy(s).wait()

    x = gbuf[...] + pos_ref[...] + typ_ref[...]        # word + position + token-type-0
    o_ref[0] = _layernorm(x, gamma_ref[...], beta_ref[...])


def bert_embeddings(input_ids, params):
    B, S = input_ids.shape
    H = params["word_emb"].shape[1]
    grid_spec = pltpu.PrefetchScalarGridSpec(
        num_scalar_prefetch=1,
        grid=(B,),
        in_specs=[
            pl.BlockSpec(memory_space=pl.ANY),             # word embeddings stay in HBM
            pl.BlockSpec((S, H), lambda b, ids: (0, 0)),   # position rows [0, S)
            pl.BlockSpec((1, H), lambda b, ids: (0, 0)),   # token-type row 0
            pl.BlockSpec((1, H), lambda b, ids: (0, 0)),   # LN gamma
            pl.BlockSpec((1, H), lambda b, ids: (0, 0)),   # LN beta
        ],
        out_specs=pl.BlockSpec((1, S, H), lambda b, ids: (b, 0, 0)),
        scratch_shapes=[pltpu.VMEM((S, H), jnp.float32),
                        pltpu.SemaphoreType.DMA((S,))],
    )
    return pl.pallas_call(
        _emb_kernel,
        out_shape=jax.ShapeDtypeStruct((B, S, H), jnp.float32),
        grid_spec=grid_spec,
        compiler_params=pltpu.CompilerParams(dimension_semantics=("arbitrary",)),
    )(input_ids.astype(jnp.int32),
      params["word_emb"],
      params["pos_emb"][:S],
      params["type_emb"][0:1],
      params["emb_ln_g"].reshape(1, H),
      params["emb_ln_b"].reshape(1, H))


# ---------------------------------------------------------------------------
# fused encoder stack: one pallas_call, grid = (num_layers, batch)
# ---------------------------------------------------------------------------
def _encoder_stack_kernel(num_heads, gelu_fn,
                          x_ref, mask_ref,
                          wqkv_ref, bqkv_ref, wo_ref, bo_ref,
                          ln1g_ref, ln1b_ref,
                          w1_ref, b1_ref, w2_ref, b2_ref,
                          ln2g_ref, ln2b_ref,
                          o_ref,
                          x_scr, head_scr, ctx_scr):
    l = pl.program_id(0)
    b = pl.program_id(1)
    n_layers = pl.num_programs(0)

    _, S, H = x_scr.shape
    hd = H // num_heads
    scale = 1.0 / math.sqrt(hd)
    bf16, f32 = jnp.bfloat16, jnp.float32

    # Layer 0 consumes the embedding output from HBM; deeper layers reuse the
    # activation kept resident in VMEM scratch (no HBM round trip between layers).
    @pl.when(l == 0)
    def _():
        x_scr[b] = x_ref[0]

    x = x_scr[b]                             # (S, H) float32
    mask = mask_ref[0]                       # (1, S) additive key bias

    # ---- fused QKV projection: single (S,H)@(H,3H) MXU pass, bf16 in / f32 acc
    qkv = jnp.dot(x.astype(bf16), wqkv_ref[0],
                  preferred_element_type=f32) + bqkv_ref[0]          # (S, 3H)
    q = qkv[:, 0 * H:1 * H]
    k = qkv[:, 1 * H:2 * H]
    v = qkv[:, 2 * H:3 * H]

    # ---- split heads into a (3, nh, S, hd) VMEM buffer (layout only, no matmuls)
    for h in range(num_heads):
        sl = slice(h * hd, (h + 1) * hd)
        head_scr[0, h] = q[:, sl]
        head_scr[1, h] = k[:, sl]
        head_scr[2, h] = v[:, sl]
    qh = head_scr[0].astype(bf16)            # (nh, S, hd)
    kh = head_scr[1].astype(bf16)
    vh = head_scr[2].astype(bf16)

    # ---- all heads batched on the MXU (f32 accumulation), softmax in f32
    sc = jnp.einsum("hqd,hkd->hqk", qh, kh, preferred_element_type=f32) * scale
    sc = sc + mask                           # broadcast over heads / query rows
    sc = sc - jnp.max(sc, axis=-1, keepdims=True)
    p = jnp.exp(sc)
    p = p * pl.reciprocal(jnp.sum(p, axis=-1, keepdims=True), approx=True)
    ctx = jnp.einsum("hqk,hkd->hqd", p.astype(bf16), vh,
                     preferred_element_type=f32)                     # (nh, S, hd)

    # ---- merge heads back to (S, H) and run ONE full-width output projection
    for h in range(num_heads):
        ctx_scr[:, h * hd:(h + 1) * hd] = ctx[h]
    attn = jnp.dot(ctx_scr[...].astype(bf16), wo_ref[0],
                   preferred_element_type=f32) + bo_ref[0]

    h1 = _layernorm(x + attn, ln1g_ref[0], ln1b_ref[0])

    # ---- feed-forward (GELU on the EUP path)
    ff = jnp.dot(h1.astype(bf16), w1_ref[0],
                 preferred_element_type=f32) + b1_ref[0]
    ff = gelu_fn(ff)
    ff2 = jnp.dot(ff.astype(bf16), w2_ref[0],
                  preferred_element_type=f32) + b2_ref[0]

    out = _layernorm(h1 + ff2, ln2g_ref[0], ln2b_ref[0])
    x_scr[b] = out                           # feed the next layer

    @pl.when(l == n_layers - 1)
    def _():
        o_ref[0] = out.astype(o_ref.dtype)


def _vmem_limit_bytes(B, S, H, I, num_heads):
    bf, f4 = 2, 4
    hd = H // num_heads
    weights = (H * 3 * H + H * H + H * I + I * H) * bf          # bf16 matmul weights
    smalls = (3 * H + H + I + 5 * H) * f4                       # biases + LN params
    blocks = (2 * S * H + S) * f4                               # x block + out block + mask
    scratch = (B * S * H + 3 * num_heads * S * hd + S * H) * f4
    interm = (S * 3 * H + 2 * num_heads * S * S + S * I + 4 * S * H) * f4
    est = 2 * (weights + smalls + blocks) + scratch + interm    # x2 = double buffering
    return int(min(max(est + (8 << 20), 32 << 20), 64 << 20))


def bert_encoder_layers(hidden, mask_bias, params, num_heads, num_layers):
    B, S, H = hidden.shape
    I = params["w1"].shape[2]
    hd = H // num_heads
    gelu_fn = _get_gelu()
    kernel = functools.partial(_encoder_stack_kernel, num_heads, gelu_fn)

    def wspec(d1, d2):
        return pl.BlockSpec((1, d1, d2), lambda l, b: (l, 0, 0))

    in_specs = [
        # embedding output: only consumed at l == 0; later steps point back to block 0
        # so the activation is not re-streamed from HBM every layer.
        pl.BlockSpec((1, S, H), lambda l, b: (jnp.where(l == 0, b, 0), 0, 0)),
        pl.BlockSpec((1, 1, S), lambda l, b: (b, 0, 0)),      # additive attention mask
        wspec(H, 3 * H), wspec(1, 3 * H),                     # Wqkv, bqkv
        wspec(H, H), wspec(1, H),                             # Wo, bo
        wspec(1, H), wspec(1, H),                             # LN1 gamma / beta
        wspec(H, I), wspec(1, I),                             # W1, b1
        wspec(I, H), wspec(1, H),                             # W2, b2
        wspec(1, H), wspec(1, H),                             # LN2 gamma / beta
    ]
    out_specs = pl.BlockSpec((1, S, H), lambda l, b: (b, 0, 0))

    return pl.pallas_call(
        kernel,
        out_shape=jax.ShapeDtypeStruct((B, S, H), jnp.float32),
        grid=(num_layers, B),            # layers outer: each layer's weights DMA'd once
        in_specs=in_specs,
        out_specs=out_specs,
        scratch_shapes=[
            pltpu.VMEM((B, S, H), jnp.float32),               # resident activations
            pltpu.VMEM((3, num_heads, S, hd), jnp.float32),   # per-head Q/K/V
            pltpu.VMEM((S, H), jnp.float32),                  # merged attention context
        ],
        compiler_params=pltpu.CompilerParams(
            dimension_semantics=("arbitrary", "parallel"),
            vmem_limit_bytes=_vmem_limit_bytes(B, S, H, I, num_heads)),
    )(hidden, mask_bias,
      params["wqkv"], params["bqkv"], params["wo"], params["bo"],
      params["ln1_g"], params["ln1_b"],
      params["w1"], params["b1"], params["w2"], params["b2"],
      params["ln2_g"], params["ln2_b"])


def bert_encoder_forward(params, input_ids, attention_mask=None,
                         retun_hidden_layer=0, num_heads=4):
    """Matches HuggingFaceBERT_Encoder.forward with masking_ratios=0.0 (no-dropout math)."""
    B, S = input_ids.shape
    num_layers_total = params["wqkv"].shape[0]
    r = retun_hidden_layer
    if r < 0:
        r = num_layers_total + 1 + r
    assert 0 <= r <= num_layers_total

    if attention_mask is None:
        attention_mask = jnp.ones((B, S), jnp.float32)
    # HF extended mask: (1 - mask) * finfo(dtype).min, broadcast over heads / queries
    mask_bias = (1.0 - attention_mask.astype(jnp.float32)) * jnp.finfo(jnp.float32).min
    mask_bias = mask_bias.reshape(B, 1, S)

    hidden = bert_embeddings(input_ids, params)               # hidden_states[0]
    if r == 0:
        return hidden
    # hidden_states[r] == output after the first r encoder layers
    return bert_encoder_layers(hidden, mask_bias, params, num_heads, num_layers=r)


# ---------------------------------------------------------------------------
# deterministic synthetic parameters (HF layout: weights stored (in, out))
# ---------------------------------------------------------------------------
def init_params(key, vocab, max_pos, H, I, num_layers):
    f32, bf16 = jnp.float32, jnp.bfloat16
    keys = jax.random.split(key, 4 + num_layers)

    def nrm(k, shape):
        return 0.02 * jax.random.normal(k, shape, f32)

    L = num_layers
    wqkv, bqkv, wo, bo = [], [], [], []
    w1, b1, w2, b2 = [], [], [], []
    for l in range(L):
        lk = jax.random.split(keys[4 + l], 10)
        wq, wk, wv = nrm(lk[0], (H, H)), nrm(lk[1], (H, H)), nrm(lk[2], (H, H))
        wqkv.append(jnp.concatenate([wq, wk, wv], axis=1))     # (H, 3H) fused QKV
        wo.append(nrm(lk[3], (H, H)))
        w1.append(nrm(lk[4], (H, I)))
        w2.append(nrm(lk[5], (I, H)))
        bqkv.append(nrm(lk[6], (1, 3 * H)))
        bo.append(nrm(lk[7], (1, H)))
        b1.append(nrm(lk[8], (1, I)))
        b2.append(nrm(lk[9], (1, H)))

    params = {
        "word_emb": nrm(keys[0], (vocab, H)),
        "pos_emb": nrm(keys[1], (max_pos, H)),
        "type_emb": nrm(keys[2], (2, H)),
        "emb_ln_g": jnp.ones((H,), f32),
        "emb_ln_b": jnp.zeros((H,), f32),
        # encoder stack: per-layer params stacked on a leading L dim;
        # matmul weights stored in bf16 (MXU-native), biases / LN params in f32.
        "wqkv": jnp.stack(wqkv).astype(bf16),    # (L, H, 3H)
        "bqkv": jnp.stack(bqkv),                 # (L, 1, 3H)
        "wo": jnp.stack(wo).astype(bf16),        # (L, H, H)
        "bo": jnp.stack(bo),                     # (L, 1, H)
        "ln1_g": jnp.ones((L, 1, H), f32),
        "ln1_b": jnp.zeros((L, 1, H), f32),
        "w1": jnp.stack(w1).astype(bf16),        # (L, H, I)
        "b1": jnp.stack(b1),                     # (L, 1, I)
        "w2": jnp.stack(w2).astype(bf16),        # (L, I, H)
        "b2": jnp.stack(b2),                     # (L, 1, H)
        "ln2_g": jnp.ones((L, 1, H), f32),
        "ln2_b": jnp.zeros((L, 1, H), f32),
    }
    return params


# ---------------------------------------------------------------------------
# plain-JAX reference (same bf16 matmul recipe) used only for a loose self-check
# ---------------------------------------------------------------------------
def _reference_forward(params, input_ids, attention_mask, retun_hidden_layer, num_heads):
    B, S = input_ids.shape
    H = params["word_emb"].shape[1]
    bf16, f32 = jnp.bfloat16, jnp.float32

    x = (params["word_emb"][input_ids] + params["pos_emb"][:S][None, :, :]
         + params["type_emb"][0][None, None, :])
    x = _layernorm(x, params["emb_ln_g"], params["emb_ln_b"])
    if retun_hidden_layer == 0:
        return x

    nh, hd = num_heads, H // num_heads
    bias = ((1.0 - attention_mask.astype(f32))
            * jnp.finfo(f32).min)[:, None, None, :]            # (B,1,1,S)
    for l in range(retun_hidden_layer):
        xb = x.astype(bf16)
        qkv = (jnp.einsum("bsh,hk->bsk", xb, params["wqkv"][l],
                          preferred_element_type=f32) + params["bqkv"][l])
        q, k, v = qkv[..., :H], qkv[..., H:2 * H], qkv[..., 2 * H:]

        def heads(t):
            return t.reshape(B, S, nh, hd).transpose(0, 2, 1, 3)

        qh, kh, vh = heads(q).astype(bf16), heads(k).astype(bf16), heads(v).astype(bf16)
        sc = (jnp.einsum("bhqd,bhkd->bhqk", qh, kh, preferred_element_type=f32)
              / math.sqrt(hd) + bias)
        p = jax.nn.softmax(sc, axis=-1)
        ctx = jnp.einsum("bhqk,bhkd->bhqd", p.astype(bf16), vh,
                         preferred_element_type=f32)
        ctx = ctx.transpose(0, 2, 1, 3).reshape(B, S, H)
        attn = (jnp.einsum("bsh,hk->bsk", ctx.astype(bf16), params["wo"][l],
                           preferred_element_type=f32) + params["bo"][l])
        h1 = _layernorm(x + attn, params["ln1_g"][l], params["ln1_b"][l])
        ff = (jnp.einsum("bsh,hi->bsi", h1.astype(bf16), params["w1"][l],
                         preferred_element_type=f32) + params["b1"][l])
        ff = jax.nn.gelu(ff, approximate=False)
        ff2 = (jnp.einsum("bsi,ih->bsh", ff.astype(bf16), params["w2"][l],
                          preferred_element_type=f32) + params["b2"][l])
        x = _layernorm(h1 + ff2, params["ln2_g"][l], params["ln2_b"][l])
    return x


if __name__ == "__main__":
    # small synthetic BERT config
    VOCAB, MAX_POS = 100, 16
    B, S, H, I = 2, 8, 32, 64
    NUM_HEADS, NUM_LAYERS = 4, 2

    key = jax.random.PRNGKey(0)
    pkey, ikey = jax.random.split(key)
    params = init_params(pkey, VOCAB, MAX_POS, H, I, NUM_LAYERS)

    input_ids = jax.random.randint(ikey, (B, S), 5, VOCAB, dtype=jnp.int32)
    attention_mask = jnp.ones((B, S), jnp.float32).at[1, S - 2:].set(0.0)  # some padding

    # default forward (retun_hidden_layer=0 -> embedding-layer hidden state)
    out_emb = bert_encoder_forward(params, input_ids, attention_mask,
                                   retun_hidden_layer=0, num_heads=NUM_HEADS)
    # full encoder stack (last hidden state)
    out_last = bert_encoder_forward(params, input_ids, attention_mask,
                                    retun_hidden_layer=NUM_LAYERS, num_heads=NUM_HEADS)
    jax.block_until_ready((out_emb, out_last))
    assert out_emb.shape == (B, S, H) and out_last.shape == (B, S, H)

    # loose numerical self-check against a plain-JAX reference using the same bf16 recipe
    ref_emb = _reference_forward(params, input_ids, attention_mask, 0, NUM_HEADS)
    ref_last = _reference_forward(params, input_ids, attention_mask, NUM_LAYERS, NUM_HEADS)
    assert float(jnp.max(jnp.abs(out_emb - ref_emb))) < 1e-3
    assert float(jnp.max(jnp.abs(out_last - ref_last))) < 5e-2

    print("KERNEL_OK")
</pallas_src>

<mosaic_0001>
module attributes {stable_mosaic.version = 11 : i64} {
  func.func @_emb_kernel(%arg0: i32, %arg1: memref<2x8xi32, #tpu.memory_space<smem>>, %arg2: memref<100x32xf32, #tpu.memory_space<any>>, %arg3: memref<8x32xf32, #tpu.memory_space<vmem>>, %arg4: memref<1x32xf32, #tpu.memory_space<vmem>>, %arg5: memref<1x32xf32, #tpu.memory_space<vmem>>, %arg6: memref<1x32xf32, #tpu.memory_space<vmem>>, %arg7: memref<1x8x32xf32, #tpu.memory_space<vmem>>, %arg8: memref<8x32xf32, #tpu.memory_space<vmem>>, %arg9: memref<8x!tpu.dma_semaphore, #tpu.memory_space<semaphore_mem>>) attributes {dimension_semantics = [#tpu.dimension_semantics<arbitrary>], iteration_bounds = array<i64: 2>, scalar_prefetch = 1 : i64, scratch_operands = 2 : i64, tpu.core_type = #tpu.core_type<tc>, window_params = [{}, {pipeline_mode = #tpu.pipeline_mode<synchronous>, transform_indices = @transform_1, window_bounds = array<i64: 8, 32>}, {pipeline_mode = #tpu.pipeline_mode<synchronous>, transform_indices = @transform_2, window_bounds = array<i64: 1, 32>}, {pipeline_mode = #tpu.pipeline_mode<synchronous>, transform_indices = @transform_3, window_bounds = array<i64: 1, 32>}, {pipeline_mode = #tpu.pipeline_mode<synchronous>, transform_indices = @transform_4, window_bounds = array<i64: 1, 32>}, {transform_indices = @transform_5, window_bounds = array<i64: 1, 8, 32>}]} {
    %0 = arith.index_cast %arg0 : i32 to index
    %c0 = arith.constant 0 : index
    %1 = memref.load %arg1[%0, %c0] : memref<2x8xi32, #tpu.memory_space<smem>>
    %c0_i32 = arith.constant 0 : i32
    %c0_i32_0 = arith.constant 0 : i32
    %2 = tpu.memref_slice %arg2[%1, %c0_i32_0] : memref<100x32xf32, #tpu.memory_space<any>> -> memref<1x32xf32, #tpu.memory_space<any>>
    %c0_i32_1 = arith.constant 0 : i32
    %c0_i32_2 = arith.constant 0 : i32
    %3 = tpu.memref_slice %arg8[%c0_i32_1, %c0_i32_2] : memref<8x32xf32, #tpu.memory_space<vmem>> -> memref<1x32xf32, #tpu.memory_space<vmem>>
    %4 = tpu.memref_slice %arg9[%c0_i32] : memref<8x!tpu.dma_semaphore, #tpu.memory_space<semaphore_mem>> -> memref<1x!tpu.dma_semaphore, #tpu.memory_space<semaphore_mem>>
    %5 = tpu.memref_squeeze %4 : memref<1x!tpu.dma_semaphore, #tpu.memory_space<semaphore_mem>> -> memref<!tpu.dma_semaphore, #tpu.memory_space<semaphore_mem>>
    tpu.enqueue_dma source(%2 : memref<1x32xf32, #tpu.memory_space<any>>) target(%3 : memref<1x32xf32, #tpu.memory_space<vmem>>) target_semaphore(%5 : memref<!tpu.dma_semaphore, #tpu.memory_space<semaphore_mem>>)
    %6 = arith.index_cast %arg0 : i32 to index
    %c1 = arith.constant 1 : index
    %7 = memref.load %arg1[%6, %c1] : memref<2x8xi32, #tpu.memory_space<smem>>
    %c1_i32 = arith.constant 1 : i32
    %c0_i32_3 = arith.constant 0 : i32
    %8 = tpu.memref_slice %arg2[%7, %c0_i32_3] : memref<100x32xf32, #tpu.memory_space<any>> -> memref<1x32xf32, #tpu.memory_space<any>>
    %c1_i32_4 = arith.constant 1 : i32
    %c0_i32_5 = arith.constant 0 : i32
    %9 = tpu.memref_slice %arg8[%c1_i32_4, %c0_i32_5] : memref<8x32xf32, #tpu.memory_space<vmem>> -> memref<1x32xf32, #tpu.memory_space<vmem>>
    %10 = tpu.memref_slice %arg9[%c1_i32] : memref<8x!tpu.dma_semaphore, #tpu.memory_space<semaphore_mem>> -> memref<1x!tpu.dma_semaphore, #tpu.memory_space<semaphore_mem>>
    %11 = tpu.memref_squeeze %10 : memref<1x!tpu.dma_semaphore, #tpu.memory_space<semaphore_mem>> -> memref<!tpu.dma_semaphore, #tpu.memory_space<semaphore_mem>>
    tpu.enqueue_dma source(%8 : memref<1x32xf32, #tpu.memory_space<any>>) target(%9 : memref<1x32xf32, #tpu.memory_space<vmem>>) target_semaphore(%11 : memref<!tpu.dma_semaphore, #tpu.memory_space<semaphore_mem>>)
    %12 = arith.index_cast %arg0 : i32 to index
    %c2 = arith.constant 2 : index
    %13 = memref.load %arg1[%12, %c2] : memref<2x8xi32, #tpu.memory_space<smem>>
    %c2_i32 = arith.constant 2 : i32
    %c0_i32_6 = arith.constant 0 : i32
    %14 = tpu.memref_slice %arg2[%13, %c0_i32_6] : memref<100x32xf32, #tpu.memory_space<any>> -> memref<1x32xf32, #tpu.memory_space<any>>
    %c2_i32_7 = arith.constant 2 : i32
    %c0_i32_8 = arith.constant 0 : i32
    %15 = tpu.memref_slice %arg8[%c2_i32_7, %c0_i32_8] : memref<8x32xf32, #tpu.memory_space<vmem>> -> memref<1x32xf32, #tpu.memory_space<vmem>>
    %16 = tpu.memref_slice %arg9[%c2_i32] : memref<8x!tpu.dma_semaphore, #tpu.memory_space<semaphore_mem>> -> memref<1x!tpu.dma_semaphore, #tpu.memory_space<semaphore_mem>>
    %17 = tpu.memref_squeeze %16 : memref<1x!tpu.dma_semaphore, #tpu.memory_space<semaphore_mem>> -> memref<!tpu.dma_semaphore, #tpu.memory_space<semaphore_mem>>
    tpu.enqueue_dma source(%14 : memref<1x32xf32, #tpu.memory_space<any>>) target(%15 : memref<1x32xf32, #tpu.memory_space<vmem>>) target_semaphore(%17 : memref<!tpu.dma_semaphore, #tpu.memory_space<semaphore_mem>>)
    %18 = arith.index_cast %arg0 : i32 to index
    %c3 = arith.constant 3 : index
    %19 = memref.load %arg1[%18, %c3] : memref<2x8xi32, #tpu.memory_space<smem>>
    %c3_i32 = arith.constant 3 : i32
    %c0_i32_9 = arith.constant 0 : i32
    %20 = tpu.memref_slice %arg2[%19, %c0_i32_9] : memref<100x32xf32, #tpu.memory_space<any>> -> memref<1x32xf32, #tpu.memory_space<any>>
    %c3_i32_10 = arith.constant 3 : i32
    %c0_i32_11 = arith.constant 0 : i32
    %21 = tpu.memref_slice %arg8[%c3_i32_10, %c0_i32_11] : memref<8x32xf32, #tpu.memory_space<vmem>> -> memref<1x32xf32, #tpu.memory_space<vmem>>
    %22 = tpu.memref_slice %arg9[%c3_i32] : memref<8x!tpu.dma_semaphore, #tpu.memory_space<semaphore_mem>> -> memref<1x!tpu.dma_semaphore, #tpu.memory_space<semaphore_mem>>
    %23 = tpu.memref_squeeze %22 : memref<1x!tpu.dma_semaphore, #tpu.memory_space<semaphore_mem>> -> memref<!tpu.dma_semaphore, #tpu.memory_space<semaphore_mem>>
    tpu.enqueue_dma source(%20 : memref<1x32xf32, #tpu.memory_space<any>>) target(%21 : memref<1x32xf32, #tpu.memory_space<vmem>>) target_semaphore(%23 : memref<!tpu.dma_semaphore, #tpu.memory_space<semaphore_mem>>)
    %24 = arith.index_cast %arg0 : i32 to index
    %c4 = arith.constant 4 : index
    %25 = memref.load %arg1[%24, %c4] : memref<2x8xi32, #tpu.memory_space<smem>>
    %c4_i32 = arith.constant 4 : i32
    %c0_i32_12 = arith.constant 0 : i32
    %26 = tpu.memref_slice %arg2[%25, %c0_i32_12] : memref<100x32xf32, #tpu.memory_space<any>> -> memref<1x32xf32, #tpu.memory_space<any>>
    %c4_i32_13 = arith.constant 4 : i32
    %c0_i32_14 = arith.constant 0 : i32
    %27 = tpu.memref_slice %arg8[%c4_i32_13, %c0_i32_14] : memref<8x32xf32, #tpu.memory_space<vmem>> -> memref<1x32xf32, #tpu.memory_space<vmem>>
    %28 = tpu.memref_slice %arg9[%c4_i32] : memref<8x!tpu.dma_semaphore, #tpu.memory_space<semaphore_mem>> -> memref<1x!tpu.dma_semaphore, #tpu.memory_space<semaphore_mem>>
    %29 = tpu.memref_squeeze %28 : memref<1x!tpu.dma_semaphore, #tpu.memory_space<semaphore_mem>> -> memref<!tpu.dma_semaphore, #tpu.memory_space<semaphore_mem>>
    tpu.enqueue_dma source(%26 : memref<1x32xf32, #tpu.memory_space<any>>) target(%27 : memref<1x32xf32, #tpu.memory_space<vmem>>) target_semaphore(%29 : memref<!tpu.dma_semaphore, #tpu.memory_space<semaphore_mem>>)
    %30 = arith.index_cast %arg0 : i32 to index
    %c5 = arith.constant 5 : index
    %31 = memref.load %arg1[%30, %c5] : memref<2x8xi32, #tpu.memory_space<smem>>
    %c5_i32 = arith.constant 5 : i32
    %c0_i32_15 = arith.constant 0 : i32
    %32 = tpu.memref_slice %arg2[%31, %c0_i32_15] : memref<100x32xf32, #tpu.memory_space<any>> -> memref<1x32xf32, #tpu.memory_space<any>>
    %c5_i32_16 = arith.constant 5 : i32
    %c0_i32_17 = arith.constant 0 : i32
    %33 = tpu.memref_slice %arg8[%c5_i32_16, %c0_i32_17] : memref<8x32xf32, #tpu.memory_space<vmem>> -> memref<1x32xf32, #tpu.memory_space<vmem>>
    %34 = tpu.memref_slice %arg9[%c5_i32] : memref<8x!tpu.dma_semaphore, #tpu.memory_space<semaphore_mem>> -> memref<1x!tpu.dma_semaphore, #tpu.memory_space<semaphore_mem>>
    %35 = tpu.memref_squeeze %34 : memref<1x!tpu.dma_semaphore, #tpu.memory_space<semaphore_mem>> -> memref<!tpu.dma_semaphore, #tpu.memory_space<semaphore_mem>>
    tpu.enqueue_dma source(%32 : memref<1x32xf32, #tpu.memory_space<any>>) target(%33 : memref<1x32xf32, #tpu.memory_space<vmem>>) target_semaphore(%35 : memref<!tpu.dma_semaphore, #tpu.memory_space<semaphore_mem>>)
    %36 = arith.index_cast %arg0 : i32 to index
    %c6 = arith.constant 6 : index
    %37 = memref.load %arg1[%36, %c6] : memref<2x8xi32, #tpu.memory_space<smem>>
    %c6_i32 = arith.constant 6 : i32
    %c0_i32_18 = arith.constant 0 : i32
    %38 = tpu.memref_slice %arg2[%37, %c0_i32_18] : memref<100x32xf32, #tpu.memory_space<any>> -> memref<1x32xf32, #tpu.memory_space<any>>
    %c6_i32_19 = arith.constant 6 : i32
    %c0_i32_20 = arith.constant 0 : i32
    %39 = tpu.memref_slice %arg8[%c6_i32_19, %c0_i32_20] : memref<8x32xf32, #tpu.memory_space<vmem>> -> memref<1x32xf32, #tpu.memory_space<vmem>>
    %40 = tpu.memref_slice %arg9[%c6_i32] : memref<8x!tpu.dma_semaphore, #tpu.memory_space<semaphore_mem>> -> memref<1x!tpu.dma_semaphore, #tpu.memory_space<semaphore_mem>>
    %41 = tpu.memref_squeeze %40 : memref<1x!tpu.dma_semaphore, #tpu.memory_space<semaphore_mem>> -> memref<!tpu.dma_semaphore, #tpu.memory_space<semaphore_mem>>
    tpu.enqueue_dma source(%38 : memref<1x32xf32, #tpu.memory_space<any>>) target(%39 : memref<1x32xf32, #tpu.memory_space<vmem>>) target_semaphore(%41 : memref<!tpu.dma_semaphore, #tpu.memory_space<semaphore_mem>>)
    %42 = arith.index_cast %arg0 : i32 to index
    %c7 = arith.constant 7 : index
    %43 = memref.load %arg1[%42, %c7] : memref<2x8xi32, #tpu.memory_space<smem>>
    %c7_i32 = arith.constant 7 : i32
    %c0_i32_21 = arith.constant 0 : i32
    %44 = tpu.memref_slice %arg2[%43, %c0_i32_21] : memref<100x32xf32, #tpu.memory_space<any>> -> memref<1x32xf32, #tpu.memory_space<any>>
    %c7_i32_22 = arith.constant 7 : i32
    %c0_i32_23 = arith.constant 0 : i32
    %45 = tpu.memref_slice %arg8[%c7_i32_22, %c0_i32_23] : memref<8x32xf32, #tpu.memory_space<vmem>> -> memref<1x32xf32, #tpu.memory_space<vmem>>
    %46 = tpu.memref_slice %arg9[%c7_i32] : memref<8x!tpu.dma_semaphore, #tpu.memory_space<semaphore_mem>> -> memref<1x!tpu.dma_semaphore, #tpu.memory_space<semaphore_mem>>
    %47 = tpu.memref_squeeze %46 : memref<1x!tpu.dma_semaphore, #tpu.memory_space<semaphore_mem>> -> memref<!tpu.dma_semaphore, #tpu.memory_space<semaphore_mem>>
    tpu.enqueue_dma source(%44 : memref<1x32xf32, #tpu.memory_space<any>>) target(%45 : memref<1x32xf32, #tpu.memory_space<vmem>>) target_semaphore(%47 : memref<!tpu.dma_semaphore, #tpu.memory_space<semaphore_mem>>)
    %48 = arith.index_cast %arg0 : i32 to index
    %c0_24 = arith.constant 0 : index
    %49 = memref.load %arg1[%48, %c0_24] : memref<2x8xi32, #tpu.memory_space<smem>>
    %c0_i32_25 = arith.constant 0 : i32
    %c0_i32_26 = arith.constant 0 : i32
    %50 = tpu.memref_slice %arg2[%49, %c0_i32_26] : memref<100x32xf32, #tpu.memory_space<any>> -> memref<1x32xf32, #tpu.memory_space<any>>
    %c0_i32_27 = arith.constant 0 : i32
    %c0_i32_28 = arith.constant 0 : i32
    %51 = tpu.memref_slice %arg8[%c0_i32_27, %c0_i32_28] : memref<8x32xf32, #tpu.memory_space<vmem>> -> memref<1x32xf32, #tpu.memory_space<vmem>>
    %52 = tpu.memref_slice %arg9[%c0_i32_25] : memref<8x!tpu.dma_semaphore, #tpu.memory_space<semaphore_mem>> -> memref<1x!tpu.dma_semaphore, #tpu.memory_space<semaphore_mem>>
    %53 = tpu.memref_squeeze %52 : memref<1x!tpu.dma_semaphore, #tpu.memory_space<semaphore_mem>> -> memref<!tpu.dma_semaphore, #tpu.memory_space<semaphore_mem>>
    tpu.wait_dma2 semaphore(%53 : memref<!tpu.dma_semaphore, #tpu.memory_space<semaphore_mem>>) src(%50 : memref<1x32xf32, #tpu.memory_space<any>>) dst(%51 : memref<1x32xf32, #tpu.memory_space<vmem>>)
    %54 = arith.index_cast %arg0 : i32 to index
    %c1_29 = arith.constant 1 : index
    %55 = memref.load %arg1[%54, %c1_29] : memref<2x8xi32, #tpu.memory_space<smem>>
    %c1_i32_30 = arith.constant 1 : i32
    %c0_i32_31 = arith.constant 0 : i32
    %56 = tpu.memref_slice %arg2[%55, %c0_i32_31] : memref<100x32xf32, #tpu.memory_space<any>> -> memref<1x32xf32, #tpu.memory_space<any>>
    %c1_i32_32 = arith.constant 1 : i32
    %c0_i32_33 = arith.constant 0 : i32
    %57 = tpu.memref_slice %arg8[%c1_i32_32, %c0_i32_33] : memref<8x32xf32, #tpu.memory_space<vmem>> -> memref<1x32xf32, #tpu.memory_space<vmem>>
    %58 = tpu.memref_slice %arg9[%c1_i32_30] : memref<8x!tpu.dma_semaphore, #tpu.memory_space<semaphore_mem>> -> memref<1x!tpu.dma_semaphore, #tpu.memory_space<semaphore_mem>>
    %59 = tpu.memref_squeeze %58 : memref<1x!tpu.dma_semaphore, #tpu.memory_space<semaphore_mem>> -> memref<!tpu.dma_semaphore, #tpu.memory_space<semaphore_mem>>
    tpu.wait_dma2 semaphore(%59 : memref<!tpu.dma_semaphore, #tpu.memory_space<semaphore_mem>>) src(%56 : memref<1x32xf32, #tpu.memory_space<any>>) dst(%57 : memref<1x32xf32, #tpu.memory_space<vmem>>)
    %60 = arith.index_cast %arg0 : i32 to index
    %c2_34 = arith.constant 2 : index
    %61 = memref.load %arg1[%60, %c2_34] : memref<2x8xi32, #tpu.memory_space<smem>>
    %c2_i32_35 = arith.constant 2 : i32
    %c0_i32_36 = arith.constant 0 : i32
    %62 = tpu.memref_slice %arg2[%61, %c0_i32_36] : memref<100x32xf32, #tpu.memory_space<any>> -> memref<1x32xf32, #tpu.memory_space<any>>
    %c2_i32_37 = arith.constant 2 : i32
    %c0_i32_38 = arith.constant 0 : i32
    %63 = tpu.memref_slice %arg8[%c2_i32_37, %c0_i32_38] : memref<8x32xf32, #tpu.memory_space<vmem>> -> memref<1x32xf32, #tpu.memory_space<vmem>>
    %64 = tpu.memref_slice %arg9[%c2_i32_35] : memref<8x!tpu.dma_semaphore, #tpu.memory_space<semaphore_mem>> -> memref<1x!tpu.dma_semaphore, #tpu.memory_space<semaphore_mem>>
    %65 = tpu.memref_squeeze %64 : memref<1x!tpu.dma_semaphore, #tpu.memory_space<semaphore_mem>> -> memref<!tpu.dma_semaphore, #tpu.memory_space<semaphore_mem>>
    tpu.wait_dma2 semaphore(%65 : memref<!tpu.dma_semaphore, #tpu.memory_space<semaphore_mem>>) src(%62 : memref<1x32xf32, #tpu.memory_space<any>>) dst(%63 : memref<1x32xf32, #tpu.memory_space<vmem>>)
    %66 = arith.index_cast %arg0 : i32 to index
    %c3_39 = arith.constant 3 : index
    %67 = memref.load %arg1[%66, %c3_39] : memref<2x8xi32, #tpu.memory_space<smem>>
    %c3_i32_40 = arith.constant 3 : i32
    %c0_i32_41 = arith.constant 0 : i32
    %68 = tpu.memref_slice %arg2[%67, %c0_i32_41] : memref<100x32xf32, #tpu.memory_space<any>> -> memref<1x32xf32, #tpu.memory_space<any>>
    %c3_i32_42 = arith.constant 3 : i32
    %c0_i32_43 = arith.constant 0 : i32
    %69 = tpu.memref_slice %arg8[%c3_i32_42, %c0_i32_43] : memref<8x32xf32, #tpu.memory_space<vmem>> -> memref<1x32xf32, #tpu.memory_space<vmem>>
    %70 = tpu.memref_slice %arg9[%c3_i32_40] : memref<8x!tpu.dma_semaphore, #tpu.memory_space<semaphore_mem>> -> memref<1x!tpu.dma_semaphore, #tpu.memory_space<semaphore_mem>>
    %71 = tpu.memref_squeeze %70 : memref<1x!tpu.dma_semaphore, #tpu.memory_space<semaphore_mem>> -> memref<!tpu.dma_semaphore, #tpu.memory_space<semaphore_mem>>
    tpu.wait_dma2 semaphore(%71 : memref<!tpu.dma_semaphore, #tpu.memory_space<semaphore_mem>>) src(%68 : memref<1x32xf32, #tpu.memory_space<any>>) dst(%69 : memref<1x32xf32, #tpu.memory_space<vmem>>)
    %72 = arith.index_cast %arg0 : i32 to index
    %c4_44 = arith.constant 4 : index
    %73 = memref.load %arg1[%72, %c4_44] : memref<2x8xi32, #tpu.memory_space<smem>>
    %c4_i32_45 = arith.constant 4 : i32
    %c0_i32_46 = arith.constant 0 : i32
    %74 = tpu.memref_slice %arg2[%73, %c0_i32_46] : memref<100x32xf32, #tpu.memory_space<any>> -> memref<1x32xf32, #tpu.memory_space<any>>
    %c4_i32_47 = arith.constant 4 : i32
    %c0_i32_48 = arith.constant 0 : i32
    %75 = tpu.memref_slice %arg8[%c4_i32_47, %c0_i32_48] : memref<8x32xf32, #tpu.memory_space<vmem>> -> memref<1x32xf32, #tpu.memory_space<vmem>>
    %76 = tpu.memref_slice %arg9[%c4_i32_45] : memref<8x!tpu.dma_semaphore, #tpu.memory_space<semaphore_mem>> -> memref<1x!tpu.dma_semaphore, #tpu.memory_space<semaphore_mem>>
    %77 = tpu.memref_squeeze %76 : memref<1x!tpu.dma_semaphore, #tpu.memory_space<semaphore_mem>> -> memref<!tpu.dma_semaphore, #tpu.memory_space<semaphore_mem>>
    tpu.wait_dma2 semaphore(%77 : memref<!tpu.dma_semaphore, #tpu.memory_space<semaphore_mem>>) src(%74 : memref<1x32xf32, #tpu.memory_space<any>>) dst(%75 : memref<1x32xf32, #tpu.memory_space<vmem>>)
    %78 = arith.index_cast %arg0 : i32 to index
    %c5_49 = arith.constant 5 : index
    %79 = memref.load %arg1[%78, %c5_49] : memref<2x8xi32, #tpu.memory_space<smem>>
    %c5_i32_50 = arith.constant 5 : i32
    %c0_i32_51 = arith.constant 0 : i32
    %80 = tpu.memref_slice %arg2[%79, %c0_i32_51] : memref<100x32xf32, #tpu.memory_space<any>> -> memref<1x32xf32, #tpu.memory_space<any>>
    %c5_i32_52 = arith.constant 5 : i32
    %c0_i32_53 = arith.constant 0 : i32
    %81 = tpu.memref_slice %arg8[%c5_i32_52, %c0_i32_53] : memref<8x32xf32, #tpu.memory_space<vmem>> -> memref<1x32xf32, #tpu.memory_space<vmem>>
    %82 = tpu.memref_slice %arg9[%c5_i32_50] : memref<8x!tpu.dma_semaphore, #tpu.memory_space<semaphore_mem>> -> memref<1x!tpu.dma_semaphore, #tpu.memory_space<semaphore_mem>>
    %83 = tpu.memref_squeeze %82 : memref<1x!tpu.dma_semaphore, #tpu.memory_space<semaphore_mem>> -> memref<!tpu.dma_semaphore, #tpu.memory_space<semaphore_mem>>
    tpu.wait_dma2 semaphore(%83 : memref<!tpu.dma_semaphore, #tpu.memory_space<semaphore_mem>>) src(%80 : memref<1x32xf32, #tpu.memory_space<any>>) dst(%81 : memref<1x32xf32, #tpu.memory_space<vmem>>)
    %84 = arith.index_cast %arg0 : i32 to index
    %c6_54 = arith.constant 6 : index
    %85 = memref.load %arg1[%84, %c6_54] : memref<2x8xi32, #tpu.memory_space<smem>>
    %c6_i32_55 = arith.constant 6 : i32
    %c0_i32_56 = arith.constant 0 : i32
    %86 = tpu.memref_slice %arg2[%85, %c0_i32_56] : memref<100x32xf32, #tpu.memory_space<any>> -> memref<1x32xf32, #tpu.memory_space<any>>
    %c6_i32_57 = arith.constant 6 : i32
    %c0_i32_58 = arith.constant 0 : i32
    %87 = tpu.memref_slice %arg8[%c6_i32_57, %c0_i32_58] : memref<8x32xf32, #tpu.memory_space<vmem>> -> memref<1x32xf32, #tpu.memory_space<vmem>>
    %88 = tpu.memref_slice %arg9[%c6_i32_55] : memref<8x!tpu.dma_semaphore, #tpu.memory_space<semaphore_mem>> -> memref<1x!tpu.dma_semaphore, #tpu.memory_space<semaphore_mem>>
    %89 = tpu.memref_squeeze %88 : memref<1x!tpu.dma_semaphore, #tpu.memory_space<semaphore_mem>> -> memref<!tpu.dma_semaphore, #tpu.memory_space<semaphore_mem>>
    tpu.wait_dma2 semaphore(%89 : memref<!tpu.dma_semaphore, #tpu.memory_space<semaphore_mem>>) src(%86 : memref<1x32xf32, #tpu.memory_space<any>>) dst(%87 : memref<1x32xf32, #tpu.memory_space<vmem>>)
    %90 = arith.index_cast %arg0 : i32 to index
    %c7_59 = arith.constant 7 : index
    %91 = memref.load %arg1[%90, %c7_59] : memref<2x8xi32, #tpu.memory_space<smem>>
    %c7_i32_60 = arith.constant 7 : i32
    %c0_i32_61 = arith.constant 0 : i32
    %92 = tpu.memref_slice %arg2[%91, %c0_i32_61] : memref<100x32xf32, #tpu.memory_space<any>> -> memref<1x32xf32, #tpu.memory_space<any>>
    %c7_i32_62 = arith.constant 7 : i32
    %c0_i32_63 = arith.constant 0 : i32
    %93 = tpu.memref_slice %arg8[%c7_i32_62, %c0_i32_63] : memref<8x32xf32, #tpu.memory_space<vmem>> -> memref<1x32xf32, #tpu.memory_space<vmem>>
    %94 = tpu.memref_slice %arg9[%c7_i32_60] : memref<8x!tpu.dma_semaphore, #tpu.memory_space<semaphore_mem>> -> memref<1x!tpu.dma_semaphore, #tpu.memory_space<semaphore_mem>>
    %95 = tpu.memref_squeeze %94 : memref<1x!tpu.dma_semaphore, #tpu.memory_space<semaphore_mem>> -> memref<!tpu.dma_semaphore, #tpu.memory_space<semaphore_mem>>
    tpu.wait_dma2 semaphore(%95 : memref<!tpu.dma_semaphore, #tpu.memory_space<semaphore_mem>>) src(%92 : memref<1x32xf32, #tpu.memory_space<any>>) dst(%93 : memref<1x32xf32, #tpu.memory_space<vmem>>)
    %c0_64 = arith.constant 0 : index
    %c0_65 = arith.constant 0 : index
    %96 = vector.load %arg8[%c0_64, %c0_65] : memref<8x32xf32, #tpu.memory_space<vmem>>, vector<8x32xf32>
    %c0_66 = arith.constant 0 : index
    %c0_67 = arith.constant 0 : index
    %97 = vector.load %arg3[%c0_66, %c0_67] : memref<8x32xf32, #tpu.memory_space<vmem>>, vector<8x32xf32>
    %98 = arith.addf %96, %97 : vector<8x32xf32>
    %c0_68 = arith.constant 0 : index
    %c0_69 = arith.constant 0 : index
    %99 = vector.load %arg4[%c0_68, %c0_69] : memref<1x32xf32, #tpu.memory_space<vmem>>, vector<1x32xf32>
    %100 = vector.broadcast %99 : vector<1x32xf32> to vector<8x32xf32>
    %101 = arith.addf %98, %100 : vector<8x32xf32>
    %c0_70 = arith.constant 0 : index
    %c0_71 = arith.constant 0 : index
    %102 = vector.load %arg5[%c0_70, %c0_71] : memref<1x32xf32, #tpu.memory_space<vmem>>, vector<1x32xf32>
    %c0_72 = arith.constant 0 : index
    %c0_73 = arith.constant 0 : index
    %103 = vector.load %arg6[%c0_72, %c0_73] : memref<1x32xf32, #tpu.memory_space<vmem>>, vector<1x32xf32>
    %cst = arith.constant dense<0.000000e+00> : vector<8xf32>
    %104 = vector.multi_reduction <add>, %101, %cst [1] : vector<8x32xf32> to vector<8xf32>
    %105 = vector.shape_cast %104 : vector<8xf32> to vector<8x1xf32>
    %cst_74 = arith.constant 3.200000e+01 : f32
    %106 = vector.broadcast %cst_74 : f32 to vector<8x1xf32>
    %107 = arith.divf %105, %106 : vector<8x1xf32>
    %108 = vector.broadcast %107 : vector<8x1xf32> to vector<8x32xf32>
    %109 = arith.subf %101, %108 : vector<8x32xf32>
    %110 = arith.mulf %109, %109 : vector<8x32xf32>
    %cst_75 = arith.constant dense<0.000000e+00> : vector<8xf32>
    %111 = vector.multi_reduction <add>, %110, %cst_75 [1] : vector<8x32xf32> to vector<8xf32>
    %112 = vector.shape_cast %111 : vector<8xf32> to vector<8x1xf32>
    %cst_76 = arith.constant 3.200000e+01 : f32
    %113 = vector.broadcast %cst_76 : f32 to vector<8x1xf32>
    %114 = arith.divf %112, %113 : vector<8x1xf32>
    %115 = vector.broadcast %107 : vector<8x1xf32> to vector<8x32xf32>
    %116 = arith.subf %101, %115 : vector<8x32xf32>
    %cst_77 = arith.constant 9.99999996E-13 : f32
    %117 = vector.broadcast %cst_77 : f32 to vector<8x1xf32>
    %118 = arith.addf %114, %117 : vector<8x1xf32>
    %119 = math.rsqrt %118 : vector<8x1xf32>
    %120 = vector.broadcast %119 : vector<8x1xf32> to vector<8x32xf32>
    %121 = arith.mulf %116, %120 : vector<8x32xf32>
    %122 = vector.broadcast %102 : vector<1x32xf32> to vector<8x32xf32>
    %123 = arith.mulf %121, %122 : vector<8x32xf32>
    %124 = vector.broadcast %103 : vector<1x32xf32> to vector<8x32xf32>
    %125 = arith.addf %123, %124 : vector<8x32xf32>
    %c0_78 = arith.constant 0 : index
    %c0_79 = arith.constant 0 : index
    %c0_80 = arith.constant 0 : index
    %126 = vector.load %arg7[%c0_78, %c0_79, %c0_80] : memref<1x8x32xf32, #tpu.memory_space<vmem>>, vector<1x8x32xf32>
    %127 = vector.shape_cast %126 : vector<1x8x32xf32> to vector<8x32xf32>
    %128 = vector.shape_cast %125 : vector<8x32xf32> to vector<1x8x32xf32>
    tpu.vector_store %arg7[%c0_78, %c0_79, %c0_80], %128 {strides = array<i32>} : memref<1x8x32xf32, #tpu.memory_space<vmem>>, vector<1x8x32xf32>,
    return
  }
  func.func @transform_1(%arg0: i32, %arg1: memref<2x8xi32, #tpu.memory_space<smem>>) -> (i32, i32) {
    %c0_i32 = arith.constant 0 : i32
    %c0_i32_0 = arith.constant 0 : i32
    %c0_i32_1 = arith.constant 0 : i32
    return %c0_i32, %c0_i32_0 : i32, i32
  }
  func.func @transform_2(%arg0: i32, %arg1: memref<2x8xi32, #tpu.memory_space<smem>>) -> (i32, i32) {
    %c0_i32 = arith.constant 0 : i32
    %c0_i32_0 = arith.constant 0 : i32
    %c0_i32_1 = arith.constant 0 : i32
    return %c0_i32, %c0_i32_0 : i32, i32
  }
  func.func @transform_3(%arg0: i32, %arg1: memref<2x8xi32, #tpu.memory_space<smem>>) -> (i32, i32) {
    %c0_i32 = arith.constant 0 : i32
    %c0_i32_0 = arith.constant 0 : i32
    %c0_i32_1 = arith.constant 0 : i32
    return %c0_i32, %c0_i32_0 : i32, i32
  }
  func.func @transform_4(%arg0: i32, %arg1: memref<2x8xi32, #tpu.memory_space<smem>>) -> (i32, i32) {
    %c0_i32 = arith.constant 0 : i32
    %c0_i32_0 = arith.constant 0 : i32
    %c0_i32_1 = arith.constant 0 : i32
    return %c0_i32, %c0_i32_0 : i32, i32
  }
  func.func @transform_5(%arg0: i32, %arg1: memref<2x8xi32, #tpu.memory_space<smem>>) -> (i32, i32, i32) {
    %c0_i32 = arith.constant 0 : i32
    %c0_i32_0 = arith.constant 0 : i32
    %c0_i32_1 = arith.constant 0 : i32
    return %arg0, %c0_i32, %c0_i32_0 : i32, i32, i32
  }
}

</mosaic_0001>

<bundles_post_ra>
// kernel: tpu_custom_call.1
= control target key start
LH: loop header
LB: loop body
LE: loop exit
PB: predicated region body
PF: predicated region fallthrough
CT: control target
= control target key end

     0   :  { %s887_s24 = smov [#allocation5]   ;;  %s1068_s0 = inlined_call_operand.vmem [shape: s32[2,8], index: 0, kind: input, shape index: {}]   ;;  %s1069_s1 = inlined_call_operand.vmem [shape: f32[100,32], index: 1, kind: input, shape index: {}]   ;;  %s1070_s2 = inlined_call_operand.vmem [shape: f32[8,32], index: 2, kind: input, shape index: {}]   ;;  %s1071_s3 = inlined_call_operand.vmem [shape: f32[1,32], index: 3, kind: input, shape index: {}]   ;;  %s1072_s4 = inlined_call_operand.vmem [shape: f32[1,32], index: 4, kind: input, shape index: {}]   ;;  %s1073_s5 = inlined_call_operand.vmem [shape: f32[1,32], index: 5, kind: input, shape index: {}]   ;;  %s1074_s6 = inlined_call_operand.hbm [shape: f32[2,8,32], index: 6, kind: output, shape index: {}]  }
   0x1   :  { %s12_s23 = sshll.u32 %s1068_s0, 4  ;;  %s13_s23 = int_to_ptr.vmem [resolvable:$true] %s12_s23 }
   0x2   :  { %15 = dma.vmem_to_smem %s13_s23, 32, %s887_s24, [#allocation4] }
   0x3   :  { %849 = dma.done.wait [#allocation4], 32 }
   0x4   :  { %850 = vsyncadd [#allocation4], 4294967264 }
   0x5   :  { %18 = sfence }
   0x6   :  { %19 = vsyncpa [#allocation7], 0 }
   0x7   :  { %21 = vsyncpa [#allocation7 + $0x1], 0  ;;  %s927_s25 = smov 0   ;;  %s929_s26 = smov 0  }
   0x8   :  { %s931_s27 = smov 0   ;;  %s933_s28 = smov 0  }
   0x9 LB: > { %s948_s0 = sadd.s32 4294967295, %s885_s28   ;;  %s728_s29 = sadd.s32 4294967294, %s885_s28   ;;  %s885_s28 = sphi %s933_s28, %s1082_s28   ;;  %s881_s27 = sphi %s931_s27, %s1081_s27   ;;  %s877_s26 = sphi %s929_s26, %s1080_s26   ;;  %s873_s25 = sphi %s927_s25, %s1079_s25  }
   0xa   : > { %s952_s30 = sadd.s32 1, %s885_s28   ;;  %s118_s7 = sadd.s32 1, %s881_s27 }
   0xb   : > { %s115_s8 = ssub.s32 %s885_s28, %s952_s30  ;;  %p128_p0 = scmp.ne.s32.totalorder %s881_s27, %s877_s26 }
   0xc   : > { %p116_p1 = scmp.eq.s32.totalorder %s115_s8, 0  ;;  %p129_p2 = scmp.eq.s32.totalorder %s948_s0, 1 }
   0xd   : > { %p134_p3 = scmp.ne.s32.totalorder %s877_s26, %s873_s25  ;;  %p135_p4 = scmp.eq.s32.totalorder %s728_s29, 1 }
   0xe   : > { %s963_s9 = scalar_select %p116_p1, %s881_s27, %s118_s7  }
   0xf   : > { %p965_p5 = por %p129_p2, %p128_p0  ;;  %p969_p6 = por %p135_p4, %p134_p3 }
  0x10   : > { %p730_p7 = scmp.ge.s32.totalorder %s885_s28, 1  ;;  %p165_p8 = scmp.lt.s32.totalorder %s885_s28, 3 }
  0x12   : > { %p166_p9 = pnand %p730_p7, %p165_p8 }
  0x13   : > { %s1075_s12 = sand.u32 (!%p166_p9), 1, %s877_s26   ;;  %s977_s13 = sshll.u32 (!%p166_p9), %s948_s0, 7 }
  0x14   : > { %169 = sbr.rel (%p166_p9) target bundleno = 393 (0x189), region = 36  ;;  %s981_s14 = sshll.u32 (!%p166_p9), %s1075_s12, 3 }
  0x15   : > { %s187_s15 = sld [smem:[#allocation5 + %s977_s13]] (!%p166_p9)  ;;  %s185_s19 = scalar_lea.vmem (!%p166_p9), [#allocation6], %s981_s14 }
  0x1b   : > { %s188_s18 = scalar_lea.vmem %s1069_s1, %s187_s15 }
  0x1c   : > { %v203_v0 = vld [vmem:[%s188_s18] sm:$0x1] }
  0x1d   : > { %204 = vst [vmem:[#allocation2] sm:$0x1] %v203_v0 }
  0x1e   : > { %222 = vsyncadd [#allocation3], 16  ;;  %s223_s20 = sadd.s32 1, %s977_s13 }
  0x1f   : > { %s224_s21 = sld [smem:[#allocation5 + %s223_s20]] }
  0x25   : > { %s225_s24 = scalar_lea.vmem %s1069_s1, %s224_s21 }
  0x26   : > { %v242_v1 = vld [vmem:[%s225_s24] sm:$0x1] }
  0x27   : > { %243 = vst [vmem:[#allocation2 + $0x1] sm:$0x1] %v242_v1 }
  0x28   : > { %261 = vsyncadd [#allocation3 + $0x1], 16  ;;  %s262_s29 = sadd.s32 2, %s977_s13 }
  0x29   : > { %s263_s7 = sld [smem:[#allocation5 + %s262_s29]] }
  0x2f   : > { %s264_s15 = scalar_lea.vmem %s1069_s1, %s263_s7 }
  0x30   : > { %v281_v2 = vld [vmem:[%s264_s15] sm:$0x1] }
  0x31   : > { %282 = vst [vmem:[#allocation2 + $0x2] sm:$0x1] %v281_v2 }
  0x32   : > { %300 = vsyncadd [#allocation3 + $0x2], 16  ;;  %s301_s17 = sadd.s32 3, %s977_s13 }
  0x33   : > { %s302_s18 = sld [smem:[#allocation5 + %s301_s17]] }
  0x39   : > { %s303_s21 = scalar_lea.vmem %s1069_s1, %s302_s18 }
  0x3a   : > { %v320_v3 = vld [vmem:[%s303_s21] sm:$0x1] }
  0x3b   : > { %321 = vst [vmem:[#allocation2 + $0x3] sm:$0x1] %v320_v3 }
  0x3c   : > { %339 = vsyncadd [#allocation3 + $0x3], 16  ;;  %s340_s22 = sadd.s32 4, %s977_s13 }
  0x3d   : > { %s341_s23 = sld [smem:[#allocation5 + %s340_s22]] }
  0x43   : > { %s342_s7 = scalar_lea.vmem %s1069_s1, %s341_s23 }
  0x44   : > { %v359_v4 = vld [vmem:[%s342_s7] sm:$0x1] }
  0x45   : > { %360 = vst [vmem:[#allocation2 + $0x4] sm:$0x1] %v359_v4 }
  0x46   : > { %378 = vsyncadd [#allocation3 + $0x4], 16  ;;  %s379_s8 = sadd.s32 5, %s977_s13 }
  0x47   : > { %s380_s16 = sld [smem:[#allocation5 + %s379_s8]] }
  0x4d   : > { %s381_s12 = scalar_lea.vmem %s1069_s1, %s380_s16 }
  0x4e   : > { %v398_v5 = vld [vmem:[%s381_s12] sm:$0x1] }
  0x4f   : > { %399 = vst [vmem:[#allocation2 + $0x5] sm:$0x1] %v398_v5 }
  0x50   : > { %417 = vsyncadd [#allocation3 + $0x5], 16  ;;  %s418_s18 = sadd.s32 6, %s977_s13 }
  0x51   : > { %s419_s20 = sld [smem:[#allocation5 + %s418_s18]] }
  0x57   : > { %s420_s23 = scalar_lea.vmem %s1069_s1, %s419_s20 }
  0x58   : > { %v437_v6 = vld [vmem:[%s420_s23] sm:$0x1] }
  0x59   : > { %438 = vst [vmem:[#allocation2 + $0x6] sm:$0x1] %v437_v6 }
  0x5a   : > { %456 = vsyncadd [#allocation3 + $0x6], 16  ;;  %s457_s24 = sadd.s32 7, %s977_s13 }
  0x5b   : > { %s458_s29 = sld [smem:[#allocation5 + %s457_s24]] }
  0x61   : > { %s459_s16 = scalar_lea.vmem %s1069_s1, %s458_s29 }
  0x62   : > { %v476_v7 = vld [vmem:[%s459_s16] sm:$0x1] }
  0x63   : > { %477 = vst [vmem:[#allocation2 + $0x7] sm:$0x1] %v476_v7 }
  0x64   : > { %495 = vsyncadd [#allocation3 + $0x7], 16 }
  0x65   : > { %851 = dma.done.wait [#allocation3], 16 }
  0x66   : > { %852 = vsyncadd [#allocation3], 4294967280 }
  0x67   : > { %853 = dma.done.wait [#allocation3 + $0x1], 16 }
  0x68   : > { %854 = vsyncadd [#allocation3 + $0x1], 4294967280 }
  0x69   : > { %855 = dma.done.wait [#allocation3 + $0x2], 16 }
  0x6a   : > { %856 = vsyncadd [#allocation3 + $0x2], 4294967280 }
  0x6b   : > { %857 = dma.done.wait [#allocation3 + $0x3], 16 }
  0x6c   : > { %858 = vsyncadd [#allocation3 + $0x3], 4294967280 }
  0x6d   : > { %859 = dma.done.wait [#allocation3 + $0x4], 16 }
  0x6e   : > { %860 = vsyncadd [#allocation3 + $0x4], 4294967280 }
  0x6f   : > { %861 = dma.done.wait [#allocation3 + $0x5], 16 }
  0x70   : > { %862 = vsyncadd [#allocation3 + $0x5], 4294967280 }
  0x71   : > { %863 = dma.done.wait [#allocation3 + $0x6], 16 }
  0x72   : > { %864 = vsyncadd [#allocation3 + $0x6], 4294967280 }
  0x73   : > { %865 = dma.done.wait [#allocation3 + $0x7], 16 }
  0x74   : > { %866 = vsyncadd [#allocation3 + $0x7], 4294967280  ;;  %v521_v8 = vld [vmem:[#allocation2] sm:$0xff]  ;;  %vm531_vm0 = vcmask 261120   ;;  %v888_v14 = vmov 32.0   ;;  %s734_s18 = sshll.u32 %s948_s0, 3 }
  0x75   : > { %v522_v9 = vld [vmem:[%s1070_s2] sm:$0xff]  ;;  %789 = vrcp.f32 %v888_v14  ;;  %s581_s24 = scalar_lea.hbm %s1074_s6, %s734_s18  ;;  %s583_s0 = sshll.u32 %s185_s19, 4  ;;  %s584_s0 = int_to_ptr.vmem [resolvable:$true] %s583_s0 }
  0x76   : > { %v523_v10 = vadd.f32 %v522_v9, %v521_v8  ;;  %v786_v11 = vld [vmem:[%s1071_s3] ss:$0 sm:$0xff]  ;;  %s585_s8 = sshll.u32 %s581_s24, 4  ;;  %s1078_s16 = sand.u32 1, %s877_s26   ;;  %s586_s8 = int_to_ptr.hbm [resolvable:$true] %s585_s8 }
  0x77   : > { %v787_v35 = vld [vmem:[%s1072_s4] ss:$0 sm:$0xff]  ;;  %s571_s13 = scalar_lea.sflag [#allocation7], %s1078_s16  ;;  %s819_s15 = sshra.s32 %s586_s8, 4  ;;  %s820_s15 = int_to_ptr.hbm [resolvable:$true] %s819_s15 }
  0x78   : > { %v528_v12 = vadd.f32 %v786_v11, %v523_v10  ;;  %v788_v38 = vld [vmem:[%s1073_s5] ss:$0 sm:$0xff]  ;;  %s821_s17 = scalar_lea.hbm %s820_s15, 8  ;;  %s825_s20 = scalar_lea.hbm %s1074_s6, 16 }
  0x79   : > { %p822_p10 = scmp.ne.s32.totalorder %s820_s15, %s821_s17  ;;  %p826_p13 = scmp.lt.s32.totalorder %s820_s15, %s1074_s6 }
  0x7a   : > { %v532_v13 = vsel %vm531_vm0, %v528_v12, 0.0  ;;  %p827_p0 = scmp.lt.s32.totalorder %s825_s20, %s821_s17 }
  0x7b   : > { %533 = vadd.xlane.f32.xlu0 %v532_v13  ;;  %v790_v15 = vpop.eup %789  ;;  %p823_p11 = pnand %p822_p10, %p965_p5 }
  0x7c   : > { %v536_v16 = vmul.f32 32.0, %v790_v15  ;;  %vm540_vm1 = vweird.f32 %v790_v15  ;;  %p828_p1 = por %p827_p0, %p826_p13 }
  0x7d   : > { %p824_p12 = pneg %p823_p11 }
  0x7e   : > { %v537_v17 = vsub.f32 1.0, %v536_v16 }
  0x7f   : > { %p829_p2 = pnand %p828_p1, %p824_p12 }
  0x80   : > { %v538_v18 = vmul.f32 %v790_v15, %v537_v17 }
  0x82   : > { %v539_v19 = vadd.f32 %v790_v15, %v538_v18 }
  0x84   : > { %v541_v20 = vsel %vm540_vm1, %v790_v15, %v539_v19 }
  0xee   : > { %v534_v21 = vpop.xlane.xlu0 %533 }
  0xef   : > { %v542_v22 = vmul.f32 %v541_v20, %v534_v21 }
  0xf1   : > { %v543_v23 = vsub.f32 %v528_v12, %v542_v22 }
  0xf3   : > { %v544_v24 = vmul.f32 %v543_v23, %v543_v23 }
  0xf5   : > { %v545_v25 = vsel %vm531_vm0, %v544_v24, 0.0 }
  0xf6   : > { %546 = vadd.xlane.f32.xlu0 %v545_v25 }
 0x169   : > { %v547_v26 = vpop.xlane.xlu0 %546 }
 0x16a   : > { %v548_v27 = vmul.f32 %v547_v26, %v541_v20 }
 0x16c   : > { %v549_v28 = vadd.f32 1e-12, %v548_v27 }
 0x16e   : > { %791 = vrsqrt.f32 %v549_v28  ;;  %vm556_vm3 = vweird.f32 %v549_v28 }
 0x174   : > { %v792_v29 = vpop.eup %791 }
 0x175   : > { %v551_v30 = vmul.f32 %v792_v29, %v549_v28  ;;  %vm557_vm2 = vweird.f32 %v792_v29 }
 0x176   : > { %vm558_vm4 = vmor %vm556_vm3, %vm557_vm2 }
 0x177   : > { %v552_v31 = vmul.f32 %v792_v29, %v551_v30 }
 0x179   : > { %v553_v32 = vmul.f32 0.5, %v552_v31 }
 0x17b   : > { %v554_v33 = vsub.f32 1.5, %v553_v32 }
 0x17d   : > { %v555_v34 = vmul.f32 %v792_v29, %v554_v33 }
 0x17f   : > { %v559_v36 = vsel %vm558_vm4, %v792_v29, %v555_v34 }
 0x180   : > { %v560_v37 = vmul.f32 %v559_v36, %v543_v23 }
 0x182   : > { %v564_v39 = vmul.f32 %v787_v35, %v560_v37 }
 0x184   : > { %v568_v40 = vadd.f32 %v788_v38, %v564_v39 }
 0x186   : > { %569 = vst.msk [vmem:[%s185_s19] sm:$0xff] %vm531_vm0, %v568_v40 }
 0x187   : > { %832 = shalt.err (!%p829_p2)
}
 0x188   : > { %745 = dma.vmem_to_hbm [thread:$0]  (%p965_p5), %s584_s0, 128, %s586_s8, %s571_s13  }
 0x189 PF: > { %p751_p3 = scmp.ge.s32.totalorder %s885_s28, 2  ;;  %s597_s14 = sand.u32 1, %s873_s25  }
 0x18a   : > { %s598_s19 = scalar_lea.sflag [#allocation7], %s597_s14 }
 0x18b   : > { %p748_p4 = pnand %p751_p3, %p969_p6 }
 0x18d   : > { %p749_p7 = pneg %p748_p4 }
 0x18f   : > { %868 = dma.done.wait (%p749_p7), %s598_s19, 128  }
 0x190   : > { %870 = vsyncadd (%p749_p7), %s598_s19, 4294967168  ;;  %p24_p8 = scmp.ge.s32.totalorder %s952_s30, 4   ;;  %s1079_s25 = smov %s877_s26 }
 0x191   : > { %s1080_s26 = smov %s881_s27  ;;  %s1081_s27 = smov %s963_s9 }
 0x192   : > { %s1082_s28 = smov %s952_s30  ;;  %26 = sbr.rel (!%p24_p8) target bundleno = 9 (0x9), region = 369 }
 0x197   :  { %604 = vsyncpa [#allocation7], 1 }
 0x198   :  { %606 = vsyncpa [#allocation7 + $0x1], 1 }
 0x199   :  { %607 = vsyncmov [#allocation3] }
 0x19c   :  { %s608_s28 = vpop.sfrf %607 }
 0x19d   :  { %p737_p5 = scmp.ne.s32.totalorder %s608_s28, 0 }
 0x19f   :  { %612 = shalt.err (%p737_p5)  }
 0x1a0   :  { %614 = vsyncmov [#allocation3 + $0x1] }
 0x1a3   :  { %s615_s10 = vpop.sfrf %614 }
 0x1a4   :  { %p738_p6 = scmp.ne.s32.totalorder %s615_s10, 0 }
 0x1a6   :  { %619 = shalt.err (%p738_p6)  }
 0x1a7   :  { %621 = vsyncmov [#allocation3 + $0x2] }
 0x1aa   :  { %s622_s11 = vpop.sfrf %621 }
 0x1ab   :  { %p739_p9 = scmp.ne.s32.totalorder %s622_s11, 0 }
 0x1ad   :  { %626 = shalt.err (%p739_p9)  }
 0x1ae   :  { %628 = vsyncmov [#allocation3 + $0x3] }
 0x1b1   :  { %s629_s23 = vpop.sfrf %628 }
 0x1b2   :  { %p740_p10 = scmp.ne.s32.totalorder %s629_s23, 0 }
 0x1b4   :  { %633 = shalt.err (%p740_p10)  }
 0x1b5   :  { %635 = vsyncmov [#allocation3 + $0x4] }
 0x1b8   :  { %s636_s30 = vpop.sfrf %635 }
 0x1b9   :  { %p741_p11 = scmp.ne.s32.totalorder %s636_s30, 0 }
 0x1bb   :  { %640 = shalt.err (%p741_p11)  }
 0x1bc   :  { %642 = vsyncmov [#allocation3 + $0x5] }
 0x1bf   :  { %s643_s1 = vpop.sfrf %642 }
 0x1c0   :  { %p742_p12 = scmp.ne.s32.totalorder %s643_s1, 0 }
 0x1c2   :  { %647 = shalt.err (%p742_p12)  }
 0x1c3   :  { %649 = vsyncmov [#allocation3 + $0x6] }
 0x1c6   :  { %s650_s2 = vpop.sfrf %649 }
 0x1c7   :  { %p743_p13 = scmp.ne.s32.totalorder %s650_s2, 0 }
 0x1c9   :  { %654 = shalt.err (%p743_p13)  }
 0x1ca   :  { %656 = vsyncmov [#allocation3 + $0x7] }
 0x1cd   :  { %s657_s3 = vpop.sfrf %656 }
 0x1ce   :  { %p744_p0 = scmp.ne.s32.totalorder %s657_s3, 0 }
 0x1d0   :  { %661 = shalt.err (%p744_p0)  }

</bundles_post_ra>
